<compile_context>
chip_gen: v7x
topology: tpu7x:2x2x1
jax: 0.10.0
libtpu: 0.0.40
codegen_flags: <defaults>
</compile_context>

<pallas_src>
import jax
import jax.numpy as jnp
from jax.experimental import pallas as pl
from jax.experimental.pallas import tpu as pltpu


# ----------------------------------------------------------------------------
# Helpers
# ----------------------------------------------------------------------------

def _round_up(x, m):
    return (x + m - 1) // m * m


def _default_vmem_limit():
    """Half the physical VMEM, capped at 64 MiB (v5e/v6e: 64 MiB, v7x: 32 MiB)."""
    try:
        cap = int(pltpu.get_tpu_info().vmem_capacity_bytes)
        return int(min(cap // 2, 64 * 1024 * 1024))
    except Exception:  # pragma: no cover - conservative fallback
        return 64 * 1024 * 1024


def _largest_divisor_leq(n, cap):
    cap = int(max(1, min(n, cap)))
    for d in range(cap, 0, -1):
        if n % d == 0:
            return d
    return 1


def _pick_fused_row_tile(H, W, C, Cp, c_l, hidden, cdt_size, out_size, budget):
    """Largest row tile T (divisor of H, T==H or T%8==0) whose working set fits.

    Accounts for double-buffered x/out blocks, double-buffered constant
    operands, the manual-DMA seg scratch, the actv scratch and the conv
    transients. Falls back to the smallest legal tile when nothing fits.
    """
    def working_set(T):
        fixed = (2 * (9 * c_l * hidden + 9 * hidden * 2 * Cp) * cdt_size  # w1+w2 (2x buffered)
                 + 2 * (hidden + 2 * Cp + 2 * C) * 4)                     # biases + stats
        per = (T + 4) * (W + 4) * c_l * cdt_size            # seg halo scratch (1x)
        per += (T + 2) * (W + 2) * hidden * cdt_size        # actv scratch
        per += 2 * T * W * C * 4 + 2 * T * W * C * out_size  # x + out blocks (2x buffered)
        per += (T + 2) * (W + 2) * (9 * c_l) * cdt_size     # conv1 im2col transient
        per += (T + 2) * (W + 2) * hidden * 4               # conv1 f32 accumulator
        per += (T + 2) * W * 3 * hidden * cdt_size          # conv2 dx-folded operand
        per += T * W * 2 * Cp * 4                           # gamma||beta f32
        per += 2 * T * W * C * 4                            # xn / out f32 values
        return fixed + per

    cands = [d for d in range(1, H + 1)
             if H % d == 0 and (d == H or d % 8 == 0)]
    fitting = [d for d in cands if working_set(d) <= budget]
    if fitting:
        return max(fitting)
    # Nothing fits: fall back to the smallest legal tile instead of T=H.
    # TODO(synk): add a W / output-channel tile axis for very large W*C (v7x).
    return min(cands)


# ----------------------------------------------------------------------------
# Pass 1: per-channel BatchNorm statistics (tiled reduction, 2-way parallel)
# ----------------------------------------------------------------------------

def _bn_stats_kernel(x_ref, out_ref):
    """Accumulate per-channel [sum; tile-centered sum-of-squares; n*mu_t^2]."""
    j = pl.program_id(1)
    TR, W, C = x_ref.shape
    n_t = float(TR * W)

    xt = x_ref[...].astype(jnp.float32).reshape(TR * W, C)
    s = jnp.sum(xt, axis=0, keepdims=True)                  # (1, C)
    mu = s * (1.0 / n_t)
    d = xt - mu
    css = jnp.sum(d * d, axis=0, keepdims=True)             # (1, C)
    nmu2 = n_t * (mu * mu)                                   # (1, C)

    @pl.when(j == 0)
    def _():
        out_ref[...] = jnp.zeros_like(out_ref)

    out_ref[0, 0:1, :] += s
    out_ref[0, 1:2, :] += css
    out_ref[0, 2:3, :] += nmu2


def bn_channel_stats(x_nhwc, *, eps, row_tile, vmem_limit_bytes):
    """Returns (2, C) f32: row 0 = mean, row 1 = rsqrt(var + eps)."""
    N, H, W, C = x_nhwc.shape
    total_rows = N * H
    x_rows = x_nhwc.reshape(total_rows, W, C)

    if row_tile is None:
        cap = max(1, (vmem_limit_bytes // 2) // max(1, 2 * W * C * 4))
        row_tile = _largest_divisor_leq(total_rows, cap)
    assert total_rows % row_tile == 0, (total_rows, row_tile)
    n_r = total_rows // row_tile
    # Leading "parallel" axis of 2 partial accumulators so both TensorCores of
    # a v7x megacore share this HBM-bound sweep (neutral on 1-TC chips).
    groups = 2 if (n_r >= 2 and n_r % 2 == 0) else 1
    bpg = n_r // groups

    raw = pl.pallas_call(
        _bn_stats_kernel,
        out_shape=jax.ShapeDtypeStruct((groups, 3, C), jnp.float32),
        grid=(groups, bpg),
        in_specs=[pl.BlockSpec((row_tile, W, C),
                               lambda p, j, bpg=bpg: (p * bpg + j, 0, 0))],
        out_specs=pl.BlockSpec((1, 3, C), lambda p, j: (p, 0, 0)),
        compiler_params=pltpu.CompilerParams(
            dimension_semantics=("parallel", "arbitrary"),
            vmem_limit_bytes=int(vmem_limit_bytes)),
        cost_estimate=pl.CostEstimate(
            flops=5 * N * H * W * C, transcendentals=0,
            bytes_accessed=N * H * W * C * 4 + groups * 3 * C * 4),
    )(x_rows)

    tot = float(N * H * W)
    sums = jnp.sum(raw, axis=0)                              # (3, C)
    mean = sums[0] / tot
    # var = (css + n*mu_t^2)/tot - mean^2 (tile-centered -> stable); biased,
    # matching BatchNorm's batch statistics (training mode, affine-free).
    var = jnp.maximum((sums[1] + sums[2]) / tot - mean * mean, 0.0)
    inv = jax.lax.rsqrt(var + eps)
    return jnp.stack([mean, inv], axis=0)                    # (2, C) f32


# ----------------------------------------------------------------------------
# Pass 2: fused segmap -> actv -> (gamma || beta) -> BN-apply + SPADE combine
# ----------------------------------------------------------------------------

def _spade_fused_kernel(seg_hbm, x_ref, w1_ref, b1_ref, w2_ref, b2_ref, st_ref,
                        out_ref, seg_buf, actv_buf, copy_sem):
    f32 = jnp.float32
    n = pl.program_id(0)
    i = pl.program_id(1)
    _, T, W, C = x_ref.shape
    hid = w1_ref.shape[1]
    c_l = seg_buf.shape[2]
    Cp = w2_ref.shape[2] // 2
    cdt = w2_ref.dtype

    # ---- manual DMA of the (T+4)-row segmap halo window; only this O(T*W*c_l)
    # window is ever resident in VMEM (segmap itself stays in HBM). ----
    row0 = pl.multiple_of(i * T, T)
    cp = pltpu.make_async_copy(seg_hbm.at[n, pl.ds(row0, T + 4)],
                               seg_buf, copy_sem)
    cp.start()

    # BN-normalize the x tile while the segmap DMA is in flight.
    mean = st_ref[0:1, :]
    inv = st_ref[1:2, :]
    xn = (x_ref[0].astype(f32).reshape(T * W, C) - mean) * inv

    cp.wait()
    segw = seg_buf[...]                                       # (T+4, W+4, c_l)

    # ---- conv1 (label_nc -> hidden, 3x3 SAME) as ONE im2col matmul (K=9*c_l)
    # on the extended (T+2, W+2) window so conv2's halo never touches HBM.
    # dx shifts via XLU rolls instead of sublane-offset relayout slices. ----
    n_sw = W + 4
    segx = jnp.concatenate(
        [segw[:, :W + 2, :],
         pltpu.roll(segw, shift=n_sw - 1, axis=1)[:, :W + 2, :],
         pltpu.roll(segw, shift=n_sw - 2, axis=1)[:, :W + 2, :]],
        axis=-1)                                              # (T+4, W+2, 3*c_l)
    seg9 = jnp.concatenate(
        [segx[0:T + 2], segx[1:T + 3], segx[2:T + 4]],
        axis=-1)                                              # (T+2, W+2, 9*c_l)
    m1 = (T + 2) * (W + 2)
    acc1 = jnp.dot(seg9.reshape(m1, 9 * c_l), w1_ref[...],
                   preferred_element_type=f32)
    actv = jnp.maximum(acc1 + b1_ref[...], 0.0).astype(cdt)
    actv_buf[...] = actv.reshape(T + 2, W + 2, hid)

    # Zero the ring that corresponds to conv2's zero padding (out-of-image
    # rows/cols) with direct slice stores instead of full-size iota masks.
    actv_buf[:, 0:1, :] = jnp.zeros((T + 2, 1, hid), cdt)
    actv_buf[:, W + 1:W + 2, :] = jnp.zeros((T + 2, 1, hid), cdt)

    @pl.when(i == 0)
    def _():
        actv_buf[0:1, :, :] = jnp.zeros((1, W + 2, hid), cdt)

    @pl.when(i == pl.num_programs(1) - 1)
    def _():
        actv_buf[T + 1:T + 2, :, :] = jnp.zeros((1, W + 2, hid), cdt)

    # ---- conv2 (hidden -> gamma||beta, 3x3 SAME): dx taps folded into K via
    # rolls (XLU), dy taps as 3 MXU matmuls with K = 3*hidden. ----
    a = actv_buf[...]                                         # (T+2, W+2, hid)
    n_a = W + 2
    actw = jnp.concatenate(
        [a[:, :W, :],
         pltpu.roll(a, shift=n_a - 1, axis=1)[:, :W, :],
         pltpu.roll(a, shift=n_a - 2, axis=1)[:, :W, :]],
        axis=-1)                                              # (T+2, W, 3*hid)
    # TODO(synk): on v5e/v6e optionally fold the dy taps too (K=9*hid, single
    # matmul) to drop the 2 MRF-pop + VALU accumulates; kept 3-dot for VMEM.
    acc2 = None
    for dy in range(3):
        lhs = actw[dy:dy + T].reshape(T * W, 3 * hid)
        p = jnp.dot(lhs, w2_ref[dy], preferred_element_type=f32)
        acc2 = p if acc2 is None else acc2 + p
    gb = acc2 + b2_ref[...]                                   # (T*W, 2*Cp) f32

    # gamma/beta blocks were padded to 128-lane multiples so both slices start
    # on a lane-tile boundary (no mid-vreg lane split when C % 128 != 0).
    gamma = gb[:, :C]
    beta = gb[:, Cp:Cp + C]
    out = xn * (1.0 + gamma) + beta
    out_ref[...] = out.reshape(1, T, W, C).astype(out_ref.dtype)


# ----------------------------------------------------------------------------
# Glue: nearest resize (F.interpolate mode='nearest') and public forward
# ----------------------------------------------------------------------------

def nearest_resize_nchw(seg, out_h, out_w):
    # Matches F.interpolate(mode='nearest') for integer upsampling factors.
    # TODO(synk): verify the floor-index rule for non-integer resize ratios.
    _, _, in_h, in_w = seg.shape
    rows = (jnp.arange(out_h) * in_h // out_h).astype(jnp.int32)
    cols = (jnp.arange(out_w) * in_w // out_w).astype(jnp.int32)
    return seg[:, :, rows[:, None], cols[None, :]]


def spade_forward_nhwc(x_nhwc, seg_nhwc, params, *, eps=1e-5,
                       compute_dtype=jnp.bfloat16, out_dtype=jnp.float32,
                       row_tile=None, stats_row_tile=None,
                       vmem_limit_bytes=None):
    """Core SPADE forward in NHWC (no layout transposes).

    `seg_nhwc` must already be resized to x's spatial size.
    """
    N, H, W, C = x_nhwc.shape
    hidden = params["w_shared"].shape[-1]
    c_l = params["w_shared"].shape[-2]
    Cp = C if C % 128 == 0 else _round_up(C, 128)
    vmem_limit = int(vmem_limit_bytes or _default_vmem_limit())
    cdt_size = jnp.dtype(compute_dtype).itemsize
    out_size = jnp.dtype(out_dtype).itemsize

    # Pass 1: global per-channel BN statistics (batch stats, affine-free).
    stats = bn_channel_stats(x_nhwc.astype(jnp.float32), eps=eps,
                             row_tile=stats_row_tile,
                             vmem_limit_bytes=vmem_limit)     # (2, C) f32

    # Only the tiny label_nc-channel segmap is padded (by 2: conv1's own SAME
    # padding + conv2's halo); x / actv / gamma / beta never round-trip HBM.
    seg_pad = jnp.pad(seg_nhwc.astype(compute_dtype),
                      ((0, 0), (2, 2), (2, 2), (0, 0)))

    if row_tile is None:
        row_tile = _pick_fused_row_tile(H, W, C, Cp, c_l, hidden, cdt_size,
                                        out_size, int(vmem_limit * 0.85))
    assert H % row_tile == 0 and (row_tile == H or row_tile % 8 == 0), row_tile
    n_i = H // row_tile

    # Weight prep (layout plumbing only, done once in XLA).
    w1 = params["w_shared"].reshape(9 * c_l, hidden).astype(compute_dtype)
    b1 = params["b_shared"].reshape(1, hidden).astype(jnp.float32)
    padc = ((0, 0), (0, 0), (0, 0), (0, Cp - C))
    w2 = jnp.concatenate([jnp.pad(params["w_gamma"], padc),
                          jnp.pad(params["w_beta"], padc)], axis=-1)
    w2 = w2.reshape(3, 3 * hidden, 2 * Cp).astype(compute_dtype)   # dy, dx*hid
    b2 = jnp.concatenate([jnp.pad(params["b_gamma"], (0, Cp - C)),
                          jnp.pad(params["b_beta"], (0, Cp - C))])
    b2 = b2.reshape(1, 2 * Cp).astype(jnp.float32)

    flops = 2 * 9 * N * H * W * hidden * (c_l + 2 * Cp)
    bytes_accessed = (seg_pad.size * cdt_size + x_nhwc.size * 4
                      + N * H * W * C * out_size
                      + w1.size * cdt_size + w2.size * cdt_size)

    # TODO(synk): single-buffer the grid-invariant operands (w1/b1/w2/b2/stats)
    # via pipeline_mode=pl.Buffered(1) on v7x; the budget already charges 2x.
    out = pl.pallas_call(
        _spade_fused_kernel,
        out_shape=jax.ShapeDtypeStruct((N, H, W, C), out_dtype),
        grid=(N, n_i),
        in_specs=[
            pl.BlockSpec(memory_space=pl.ANY),                 # segmap stays in HBM
            pl.BlockSpec((1, row_tile, W, C), lambda n, i: (n, i, 0, 0)),
            pl.BlockSpec((9 * c_l, hidden),   lambda n, i: (0, 0)),
            pl.BlockSpec((1, hidden),         lambda n, i: (0, 0)),
            pl.BlockSpec((3, 3 * hidden, 2 * Cp), lambda n, i: (0, 0, 0)),
            pl.BlockSpec((1, 2 * Cp),         lambda n, i: (0, 0)),
            pl.BlockSpec((2, C),              lambda n, i: (0, 0)),
        ],
        out_specs=pl.BlockSpec((1, row_tile, W, C), lambda n, i: (n, i, 0, 0)),
        scratch_shapes=[
            pltpu.VMEM((row_tile + 4, W + 4, c_l), compute_dtype),     # seg halo
            pltpu.VMEM((row_tile + 2, W + 2, hidden), compute_dtype),  # actv
            pltpu.SemaphoreType.DMA,
        ],
        compiler_params=pltpu.CompilerParams(
            dimension_semantics=("parallel", "parallel"),
            vmem_limit_bytes=vmem_limit),
        cost_estimate=pl.CostEstimate(flops=int(flops), transcendentals=0,
                                      bytes_accessed=int(bytes_accessed)),
    )(seg_pad, x_nhwc, w1, b1, w2, b2, stats)
    return out


def spade_forward(x_nchw, segmap_nchw, params, *, eps=1e-5,
                  compute_dtype=jnp.bfloat16, out_dtype=jnp.float32,
                  row_tile=None, stats_row_tile=None, vmem_limit_bytes=None):
    """PyTorch-layout (NCHW) wrapper. Prefer spade_forward_nhwc end-to-end to
    skip the boundary transposes (they cost an extra HBM read+write)."""
    N, C, H, W = x_nchw.shape
    seg = nearest_resize_nchw(segmap_nchw, H, W)
    x_nhwc = jnp.transpose(x_nchw, (0, 2, 3, 1))
    seg_nhwc = jnp.transpose(seg, (0, 2, 3, 1))
    out_nhwc = spade_forward_nhwc(
        x_nhwc, seg_nhwc, params, eps=eps, compute_dtype=compute_dtype,
        out_dtype=out_dtype, row_tile=row_tile, stats_row_tile=stats_row_tile,
        vmem_limit_bytes=vmem_limit_bytes)
    return jnp.transpose(out_nhwc, (0, 3, 1, 2))


# ----------------------------------------------------------------------------
# Pure-JAX reference (for correctness check)
# ----------------------------------------------------------------------------

def _conv3x3_ref(x_nhwc, w_hwio, b):
    y = jax.lax.conv_general_dilated(
        x_nhwc, w_hwio, window_strides=(1, 1), padding="SAME",
        dimension_numbers=("NHWC", "HWIO", "NHWC"))
    return y + b


def spade_ref(x_nchw, segmap_nchw, params, *, eps=1e-5):
    N, C, H, W = x_nchw.shape
    mean = jnp.mean(x_nchw, axis=(0, 2, 3), keepdims=True)
    var = jnp.var(x_nchw, axis=(0, 2, 3), keepdims=True)
    normalized = (x_nchw - mean) * jax.lax.rsqrt(var + eps)
    seg = nearest_resize_nchw(segmap_nchw, H, W)
    seg_nhwc = jnp.transpose(seg, (0, 2, 3, 1))
    actv = jax.nn.relu(_conv3x3_ref(seg_nhwc, params["w_shared"], params["b_shared"]))
    gamma = _conv3x3_ref(actv, params["w_gamma"], params["b_gamma"])
    beta = _conv3x3_ref(actv, params["w_beta"], params["b_beta"])
    gamma = jnp.transpose(gamma, (0, 3, 1, 2))
    beta = jnp.transpose(beta, (0, 3, 1, 2))
    return normalized * (1.0 + gamma) + beta


# ----------------------------------------------------------------------------
# Deterministic parameter init + demo
# ----------------------------------------------------------------------------

def init_params(key, norm_nc, label_nc, hidden=128):
    k = jax.random.split(key, 6)
    s1 = 1.0 / (3.0 * 3.0 * label_nc) ** 0.5
    s2 = 1.0 / (3.0 * 3.0 * hidden) ** 0.5
    return {
        # HWIO weight layout (equivalent to PyTorch OIHW after transpose)
        "w_shared": jax.random.normal(k[0], (3, 3, label_nc, hidden), jnp.float32) * s1,
        "b_shared": jax.random.normal(k[1], (hidden,), jnp.float32) * s1,
        "w_gamma": jax.random.normal(k[2], (3, 3, hidden, norm_nc), jnp.float32) * s2,
        "b_gamma": jax.random.normal(k[3], (norm_nc,), jnp.float32) * s2,
        "w_beta": jax.random.normal(k[4], (3, 3, hidden, norm_nc), jnp.float32) * s2,
        "b_beta": jax.random.normal(k[5], (norm_nc,), jnp.float32) * s2,
    }


if __name__ == "__main__":
    norm_nc, label_nc = 4, 3
    N, H, W = 2, 16, 16

    key = jax.random.PRNGKey(0)
    kx, ks, kp = jax.random.split(key, 3)
    x = jax.random.normal(kx, (N, norm_nc, H, W), jnp.float32)          # NCHW
    segmap = jax.random.normal(ks, (N, label_nc, 8, 8), jnp.float32)    # NCHW, upsampled
    params = init_params(kp, norm_nc, label_nc)

    ref = jax.block_until_ready(spade_ref(x, segmap, params))

    # f32 compute path (tight check): row_tile=8 exercises the row-tile halo
    # path; stats_row_tile=8 exercises the 2-group cross-tile stats reduction.
    out32 = jax.block_until_ready(
        spade_forward(x, segmap, params, compute_dtype=jnp.float32,
                      row_tile=8, stats_row_tile=8))
    assert out32.shape == (N, norm_nc, H, W)
    assert jnp.allclose(out32, ref, atol=2e-3, rtol=2e-3), \
        f"f32 max abs err {float(jnp.max(jnp.abs(out32 - ref)))}"

    # Default bf16 MXU path with auto tile selection (looser check vs f32 ref).
    outbf = jax.block_until_ready(spade_forward(x, segmap, params))
    assert outbf.shape == (N, norm_nc, H, W)
    assert jnp.allclose(outbf, ref, atol=6e-2, rtol=6e-2), \
        f"bf16 max abs err {float(jnp.max(jnp.abs(outbf - ref)))}"

    print("KERNEL_OK")
</pallas_src>

<mosaic_0001>
module attributes {stable_mosaic.version = 11 : i64} {
  func.func @_bn_stats_kernel(%arg0: i32, %arg1: i32, %arg2: memref<8x16x4xf32, #tpu.memory_space<vmem>>, %arg3: memref<1x3x4xf32, #tpu.memory_space<vmem>>) attributes {dimension_semantics = [#tpu.dimension_semantics<parallel>, #tpu.dimension_semantics<arbitrary>], iteration_bounds = array<i64: 2, 2>, scalar_prefetch = 0 : i64, scratch_operands = 0 : i64, tpu.core_type = #tpu.core_type<tc>, window_params = [{transform_indices = @transform_0, window_bounds = array<i64: 8, 16, 4>}, {transform_indices = @transform_1, window_bounds = array<i64: 1, 3, 4>}]} {
    %c0 = arith.constant 0 : index
    %c0_0 = arith.constant 0 : index
    %c0_1 = arith.constant 0 : index
    %0 = vector.load %arg2[%c0, %c0_0, %c0_1] : memref<8x16x4xf32, #tpu.memory_space<vmem>>, vector<8x16x4xf32>
    %1 = vector.shape_cast %0 : vector<8x16x4xf32> to vector<128x4xf32>
    %cst = arith.constant dense<0.000000e+00> : vector<4xf32>
    %2 = vector.multi_reduction <add>, %1, %cst [0] : vector<128x4xf32> to vector<4xf32>
    %3 = vector.shape_cast %2 : vector<4xf32> to vector<1x4xf32>
    %cst_2 = arith.constant 7.812500e-03 : f32
    %4 = vector.broadcast %cst_2 : f32 to vector<1x4xf32>
    %5 = arith.mulf %3, %4 : vector<1x4xf32>
    %6 = vector.broadcast %5 : vector<1x4xf32> to vector<128x4xf32>
    %7 = arith.subf %1, %6 : vector<128x4xf32>
    %8 = arith.mulf %7, %7 : vector<128x4xf32>
    %cst_3 = arith.constant dense<0.000000e+00> : vector<4xf32>
    %9 = vector.multi_reduction <add>, %8, %cst_3 [0] : vector<128x4xf32> to vector<4xf32>
    %10 = vector.shape_cast %9 : vector<4xf32> to vector<1x4xf32>
    %11 = arith.mulf %5, %5 : vector<1x4xf32>
    %cst_4 = arith.constant 1.280000e+02 : f32
    %12 = vector.broadcast %cst_4 : f32 to vector<1x4xf32>
    %13 = arith.mulf %12, %11 : vector<1x4xf32>
    %c0_i32 = arith.constant 0 : i32
    %14 = arith.cmpi eq, %arg1, %c0_i32 : i32
    %15 = arith.extui %14 : i1 to i32
    %c0_i32_5 = arith.constant 0 : i32
    %16 = arith.cmpi ne, %15, %c0_i32_5 : i32
    scf.if %16 {
      %cst_22 = arith.constant 0.000000e+00 : f32
      %35 = vector.broadcast %cst_22 : f32 to vector<1x3x4xf32>
      %c0_23 = arith.constant 0 : index
      %c0_24 = arith.constant 0 : index
      %c0_25 = arith.constant 0 : index
      %36 = vector.load %arg3[%c0_23, %c0_24, %c0_25] : memref<1x3x4xf32, #tpu.memory_space<vmem>>, vector<1x3x4xf32>
      tpu.vector_store %arg3[%c0_23, %c0_24, %c0_25], %35 {strides = array<i32>} : memref<1x3x4xf32, #tpu.memory_space<vmem>>, vector<1x3x4xf32>,
    } else {
    }
    %c0_6 = arith.constant 0 : index
    %c0_7 = arith.constant 0 : index
    %c0_8 = arith.constant 0 : index
    %17 = vector.load %arg3[%c0_6, %c0_7, %c0_8] : memref<1x3x4xf32, #tpu.memory_space<vmem>>, vector<1x1x4xf32>
    %18 = vector.shape_cast %17 : vector<1x1x4xf32> to vector<1x4xf32>
    %19 = arith.addf %18, %3 : vector<1x4xf32>
    %c0_9 = arith.constant 0 : index
    %c0_10 = arith.constant 0 : index
    %c0_11 = arith.constant 0 : index
    %20 = vector.load %arg3[%c0_9, %c0_10, %c0_11] : memref<1x3x4xf32, #tpu.memory_space<vmem>>, vector<1x1x4xf32>
    %21 = vector.shape_cast %20 : vector<1x1x4xf32> to vector<1x4xf32>
    %22 = vector.shape_cast %19 : vector<1x4xf32> to vector<1x1x4xf32>
    tpu.vector_store %arg3[%c0_9, %c0_10, %c0_11], %22 {strides = array<i32>} : memref<1x3x4xf32, #tpu.memory_space<vmem>>, vector<1x1x4xf32>,
    %c0_12 = arith.constant 0 : index
    %c1 = arith.constant 1 : index
    %c0_13 = arith.constant 0 : index
    %23 = vector.load %arg3[%c0_12, %c1, %c0_13] : memref<1x3x4xf32, #tpu.memory_space<vmem>>, vector<1x1x4xf32>
    %24 = vector.shape_cast %23 : vector<1x1x4xf32> to vector<1x4xf32>
    %25 = arith.addf %24, %10 : vector<1x4xf32>
    %c0_14 = arith.constant 0 : index
    %c1_15 = arith.constant 1 : index
    %c0_16 = arith.constant 0 : index
    %26 = vector.load %arg3[%c0_14, %c1_15, %c0_16] : memref<1x3x4xf32, #tpu.memory_space<vmem>>, vector<1x1x4xf32>
    %27 = vector.shape_cast %26 : vector<1x1x4xf32> to vector<1x4xf32>
    %28 = vector.shape_cast %25 : vector<1x4xf32> to vector<1x1x4xf32>
    tpu.vector_store %arg3[%c0_14, %c1_15, %c0_16], %28 {strides = array<i32>} : memref<1x3x4xf32, #tpu.memory_space<vmem>>, vector<1x1x4xf32>,
    %c0_17 = arith.constant 0 : index
    %c2 = arith.constant 2 : index
    %c0_18 = arith.constant 0 : index
    %29 = vector.load %arg3[%c0_17, %c2, %c0_18] : memref<1x3x4xf32, #tpu.memory_space<vmem>>, vector<1x1x4xf32>
    %30 = vector.shape_cast %29 : vector<1x1x4xf32> to vector<1x4xf32>
    %31 = arith.addf %30, %13 : vector<1x4xf32>
    %c0_19 = arith.constant 0 : index
    %c2_20 = arith.constant 2 : index
    %c0_21 = arith.constant 0 : index
    %32 = vector.load %arg3[%c0_19, %c2_20, %c0_21] : memref<1x3x4xf32, #tpu.memory_space<vmem>>, vector<1x1x4xf32>
    %33 = vector.shape_cast %32 : vector<1x1x4xf32> to vector<1x4xf32>
    %34 = vector.shape_cast %31 : vector<1x4xf32> to vector<1x1x4xf32>
    tpu.vector_store %arg3[%c0_19, %c2_20, %c0_21], %34 {strides = array<i32>} : memref<1x3x4xf32, #tpu.memory_space<vmem>>, vector<1x1x4xf32>,
    return
  }
  func.func @transform_0(%arg0: i32, %arg1: i32) -> (i32, i32, i32) {
    %c2_i32 = arith.constant 2 : i32
    %0 = arith.muli %arg0, %c2_i32 : i32
    %1 = arith.addi %0, %arg1 : i32
    %c0_i32 = arith.constant 0 : i32
    %c0_i32_0 = arith.constant 0 : i32
    %c0_i32_1 = arith.constant 0 : i32
    return %1, %c0_i32, %c0_i32_0 : i32, i32, i32
  }
  func.func @transform_1(%arg0: i32, %arg1: i32) -> (i32, i32, i32) {
    %c0_i32 = arith.constant 0 : i32
    %c0_i32_0 = arith.constant 0 : i32
    %c0_i32_1 = arith.constant 0 : i32
    return %arg0, %c0_i32, %c0_i32_0 : i32, i32, i32
  }
}

</mosaic_0001>

<bundles_post_ra>
// kernel: tpu_custom_call.1
= control target key start
LH: loop header
LB: loop body
LE: loop exit
PB: predicated region body
PF: predicated region fallthrough
CT: control target
= control target key end

     0   :  { %6 = vsyncpa [#allocation3], 0  ;;  %s984_s0 = inlined_call_operand.hbm [shape: f32[32,16,4], index: 0, kind: input, shape index: {}]   ;;  %s985_s1 = inlined_call_operand.hbm [shape: f32[2,3,4], index: 1, kind: output, shape index: {}]  }
   0x1   :  { %8 = vsyncpa [#allocation3 + $0x1], 0 }
   0x2   :  { %9 = vsyncpa [#allocation4], 0 }
   0x3   :  { %11 = vsyncpa [#allocation4 + $0x1], 0  ;;  %s691_s6 = smov 0   ;;  %s693_s7 = smov 0  }
   0x4   :  { %s695_s8 = smov 0   ;;  %s697_s9 = smov 0  }
   0x5   :  { %s699_s10 = smov 0   ;;  %s701_s11 = smov 0  }
   0x6   :  { %s703_s12 = smov 0   ;;  %s705_s13 = smov 0  }
   0x7   :  { %s707_s14 = smov 0   ;;  %s709_s15 = smov 0  }
   0x8   :  { %s711_s16 = smov 0  }
   0x9 LB: > { %s396_s17 = sadd.s32 4294967295, %s674_s16   ;;  %s397_s18 = sadd.s32 4294967294, %s674_s16   ;;  %s674_s16 = sphi %s711_s16, %s17_s16   ;;  %s670_s15 = sphi %s709_s15, %s1003_s15   ;;  %s666_s14 = sphi %s707_s14, %s1002_s14   ;;  %s662_s13 = sphi %s705_s13, %s1001_s13   ;;  %s658_s12 = sphi %s703_s12, %s1000_s12   ;;  %s654_s11 = sphi %s701_s11, %s999_s11   ;;  %s650_s10 = sphi %s699_s10, %s998_s10   ;;  %s646_s9 = sphi %s697_s9, %s997_s9   ;;  %s642_s8 = sphi %s695_s8, %s996_s8   ;;  %s638_s7 = sphi %s693_s7, %s995_s7   ;;  %s634_s6 = sphi %s691_s6, %s994_s6  }
   0xa   : > { %s26_s19 = sadd.s32 1, %s666_s14  ;;  %s29_s20 = sadd.s32 1, %s670_s15 }
   0xb   : > { %p27_p0 = scmp.ge.s32.totalorder %s26_s19, 2  ;;  %s398_s21 = sshll.u32 %s670_s15, 1 }
   0xc   : > { %s750_s22 = sadd.s32 %s666_s14, %s398_s21  ;;  %s40_s23 = sadd.s32 1, %s654_s11 }
   0xd   : > { %s1005_s19 = smov (%p27_p0, %s26_s19), 0  ;;  %s1007_s20 = smov (!%p27_p0, %s29_s20), %s670_s15 }
   0xe   : > { %p47_p1 = scmp.ne.s32.totalorder %s654_s11, %s650_s10  ;;  %p48_p2 = scmp.eq.s32.totalorder %s674_s16, 0 }
   0xf   : > { %p31_p3 = scmp.ge.s32.totalorder %s1007_s20, 2  ;;  %p53_p4 = scmp.ne.s32.totalorder %s650_s10, %s646_s9 }
  0x10   : > { %p760_p5 = por %p48_p2, %p47_p1  ;;  %p54_p6 = scmp.eq.s32.totalorder %s396_s17, 0 }
  0x11   : > { %s1009_s20 = smov (%p31_p3, %s1007_s20), 0  ;;  %s66_s26 = sadd.s32 1, %s642_s8 }
  0x12   : > { %p766_p7 = por %p54_p6, %p53_p4  ;;  %s399_s27 = sshll.u32 %s1009_s20, 1 }
  0x13   : > { %s63_s28 = ssub.s32 %s670_s15, %s1009_s20  ;;  %s36_s29 = sadd.s32 %s399_s27, %s1005_s19 }
  0x14   : > { %p64_p8 = scmp.eq.s32.totalorder %s63_s28, 0  ;;  %s37_s30 = ssub.s32 %s750_s22, %s36_s29 }
  0x15   : > { %p76_p9 = scmp.ne.s32.totalorder %s642_s8, %s638_s7  ;;  %p38_p10 = scmp.eq.s32.totalorder %s37_s30, 0 }
  0x16   : > { %p77_p11 = scmp.eq.s32.totalorder %s396_s17, 3  ;;  %p82_p13 = scmp.ne.s32.totalorder %s638_s7, %s634_s6 }
  0x17   : > { %s779_s2 = scalar_select %p64_p8, %s642_s8, %s66_s26  }
  0x18   : > { %s782_s3 = scalar_select %p38_p10, %s654_s11, %s40_s23  }
  0x19   : > { %p784_p12 = por %p77_p11, %p76_p9  ;;  %p83_p0 = scmp.eq.s32.totalorder %s397_s18, 3 }
  0x1a   : > { %p429_p1 = scmp.lt.s32.totalorder %s674_s16, 4  ;;  %s103_s5 = sand.u32 1, %s654_s11  }
  0x1b   : > { %s989_s4 = scalar_select %p784_p12, 1, 0 }
  0x1c   : > { %p794_p2 = por %p83_p0, %p82_p13  ;;  %s402_s21 = sshll.u32 %s103_s5, 7 }
  0x1d   : > { %s416_s27 = sshll.u32 %s750_s22, 11  ;;  %s107_s28 = scalar_lea.vmem [#allocation2], %s402_s21 }
  0x1e   : > { %s990_s9 = scalar_select %p794_p2, 1, 0 }
  0x1f   : > { %s802_s23 = scalar_lea.hbm %s984_s0, %s416_s27  ;;  %s117_s29 = sshll.u32 %s107_s28, 4  ;;  %s810_s29 = int_to_ptr.vmem [resolvable:$true] %s117_s29 }
  0x20   : > { %p806_p3 = pnand %p429_p1, %p760_p5  ;;  %s812_s22 = scalar_lea.sflag [#allocation3], %s103_s5 }
  0x21   : > { %s522_s30 = scalar_lea.hbm %s802_s23, 2048  ;;  %s527_s27 = scalar_lea.hbm %s984_s0, 8192 }
  0x22   : > { %p523_p4 = scmp.ne.s32.totalorder %s802_s23, %s522_s30  ;;  %p524_p6 = pneg %p806_p3 }
  0x23   : > { %p528_p5 = scmp.lt.u32.totalorder %s802_s23, %s984_s0  ;;  %p529_p10 = scmp.lt.u32.totalorder %s527_s27, %s522_s30 }
  0x24   : > { %p525_p8 = pnand %p524_p6, %p523_p4  ;;  %p531_p13 = scmp.lt.u32.totalorder %s522_s30, %s802_s23 }
  0x25   : > { %p530_p11 = por %p529_p10, %p528_p5 }
  0x26   : > { %p526_p9 = pneg %p525_p8 }
  0x27   : > { %p532_p0 = por %p531_p13, %p530_p11 }
  0x29   : > { %p533_p1 = pnand %p532_p0, %p526_p9 }
  0x2b   : > { %536 = shalt.err (!%p533_p1)
}
  0x2c   : > { %s537_s5 = scalar_lea.vmem %s810_s29, 2048  ;;  %s676_s28 = smov [#allocation2]  }
  0x2d   : > { %p538_p4 = scmp.ne.s32.totalorder %s810_s29, %s537_s5  ;;  %s542_s21 = sshll.u32 %s676_s28, 4  ;;  %s543_s21 = int_to_ptr.vmem [resolvable:$false] %s542_s21 }
  0x2e   : > { %s544_s24 = scalar_lea.vmem %s543_s21, 4096  ;;  %p545_p12 = scmp.lt.s32.totalorder %s810_s29, %s543_s21 }
  0x2f   : > { %p540_p8 = pnand %p538_p4, %p524_p6  ;;  %p546_p5 = scmp.lt.s32.totalorder %s544_s24, %s537_s5 }
  0x31   : > { %p541_p2 = pneg %p540_p8  ;;  %p547_p10 = por %p546_p5, %p545_p12 }
  0x33   : > { %p548_p11 = pnand %p547_p10, %p541_p2 }
  0x35   : > { %551 = shalt.err (!%p548_p11)
}
  0x36   : > { %s677_s30 = smov 128   ;;  %s678_s27 = smov 8  }
  0x37   : > { %424 = dma.hbm_to_vmem [thread:$0]  (!%p806_p3), %s802_s23, 2048, %s810_s29, %s812_s22, %s677_s30, %s677_s30, %s678_s27  }
  0x38   : > { %p407_p6 = scmp.ge.s32.totalorder %s674_s16, 1  ;;  %p125_p9 = scmp.lt.s32.totalorder %s674_s16, 5 }
  0x3a   : > { %p126_p13 = pnand %p407_p6, %p125_p9 }
  0x3b   : > { %s131_s17 = sand.u32 (!%p126_p13), 1, %s650_s10  }
  0x3c   : > { %129 = sbr.rel (%p126_p13) target bundleno = 186 (0xba), region = 24  ;;  %s408_s26 = sshll.u32 (!%p126_p13), %s131_s17, 7 }
  0x3d   : > { %s132_s5 = scalar_lea.sflag (!%p126_p13), [#allocation3], %s131_s17  ;;  %s843_s28 = scalar_lea.vmem (!%p126_p13), [#allocation2], %s408_s26 }
  0x43   : > { %625 = dma.done.wait (%p766_p7), %s132_s5, 2048  }
  0x44   : > { %627 = vsyncadd (%p766_p7), %s132_s5, 4294965248  ;;  %s151_s23 = sand.u32 1, %s638_s7   ;;  %vm173_vm0 = vcmask 31744   ;;  %v157_v0 = vld [vmem:[%s843_s28] sm:$0xff]  ;;  %v158_v1 = vld [vmem:[%s843_s28 + $0x8] sm:$0xff]  ;;  %p410_p7 = scmp.ne.s32.totalorder %s658_s12, 0 }
  0x45   : > { %s852_s29 = sshll.u32 %s151_s23, 2  ;;  %v159_v2 = vld [vmem:[%s843_s28 + $0x10] sm:$0xff]  ;;  %v160_v3 = vld [vmem:[%s843_s28 + $0x18] sm:$0xff]  ;;  %v174_v4 = vsel %vm173_vm0, %v157_v0, 0.0  ;;  %v175_v5 = vsel %vm173_vm0, %v158_v1, 0.0  ;;  %v161_v7 = vld [vmem:[%s843_s28 + $0x20] sm:$0xff] }
  0x46   : > { %v177_v6 = vsel %vm173_vm0, %v159_v2, 0.0  ;;  %v176_v8 = vadd.f32 %v175_v5, %v174_v4  ;;  %v179_v9 = vsel %vm173_vm0, %v160_v3, 0.0  ;;  %v162_v10 = vld [vmem:[%s843_s28 + $0x28] sm:$0xff]  ;;  %v181_v12 = vsel %vm173_vm0, %v161_v7, 0.0  ;;  %v163_v13 = vld [vmem:[%s843_s28 + $0x30] sm:$0xff]  ;;  %v164_v16 = vld [vmem:[%s843_s28 + $0x38] sm:$0xff] }
  0x47   : > { %v183_v15 = vsel %vm173_vm0, %v162_v10, 0.0  ;;  %v185_v18 = vsel %vm173_vm0, %v163_v13, 0.0  ;;  %v165_v19 = vld [vmem:[%s843_s28 + $0x40] sm:$0xff]  ;;  %v187_v21 = vsel %vm173_vm0, %v164_v16, 0.0  ;;  %v166_v22 = vld [vmem:[%s843_s28 + $0x48] sm:$0xff]  ;;  %v167_v25 = vld [vmem:[%s843_s28 + $0x50] sm:$0xff] }
  0x48   : > { %v178_v11 = vadd.f32 %v177_v6, %v176_v8  ;;  %v189_v24 = vsel %vm173_vm0, %v165_v19, 0.0  ;;  %v191_v27 = vsel %vm173_vm0, %v166_v22, 0.0  ;;  %v168_v28 = vld [vmem:[%s843_s28 + $0x58] sm:$0xff]  ;;  %v193_v30 = vsel %vm173_vm0, %v167_v25, 0.0  ;;  %v169_v31 = vld [vmem:[%s843_s28 + $0x60] sm:$0xff]  ;;  %v170_v34 = vld [vmem:[%s843_s28 + $0x68] sm:$0xff] }
  0x49   : > { %v195_v33 = vsel %vm173_vm0, %v168_v28, 0.0  ;;  %v197_v36 = vsel %vm173_vm0, %v169_v31, 0.0  ;;  %v882_v37 = vld [vmem:[%s843_s28 + $0x70] sm:$0xff]  ;;  %v199_v39 = vsel %vm173_vm0, %v170_v34, 0.0  ;;  %v886_v40 = vld [vmem:[%s843_s28 + $0x78] sm:$0xff]  ;;  %s153_s25 = scalar_lea.vmem [#allocation5], %s852_s29 }
  0x4a   : > { %v180_v14 = vadd.f32 %v179_v9, %v178_v11  ;;  %v201_v42 = vsel %vm173_vm0, %v882_v37, 0.0  ;;  %v203_v44 = vsel %vm173_vm0, %v886_v40, 0.0  ;;  %vm287_vm1 = vcmask (!%p410_p7), 26624  }
  0x4c   : > { %v182_v17 = vadd.f32 %v181_v12, %v180_v14 }
  0x4e   : > { %v184_v20 = vadd.f32 %v183_v15, %v182_v17 }
  0x50   : > { %v186_v23 = vadd.f32 %v185_v18, %v184_v20 }
  0x52   : > { %v188_v26 = vadd.f32 %v187_v21, %v186_v23 }
  0x54   : > { %v190_v29 = vadd.f32 %v189_v24, %v188_v26 }
  0x56   : > { %v192_v32 = vadd.f32 %v191_v27, %v190_v29 }
  0x58   : > { %v194_v35 = vadd.f32 %v193_v30, %v192_v32 }
  0x5a   : > { %v196_v38 = vadd.f32 %v195_v33, %v194_v35 }
  0x5c   : > { %v198_v41 = vadd.f32 %v197_v36, %v196_v38 }
  0x5e   : > { %v200_v43 = vadd.f32 %v199_v39, %v198_v41 }
  0x60   : > { %v202_v45 = vadd.f32 %v201_v42, %v200_v43 }
  0x62   : > { %v204_v46 = vadd.f32 %v203_v44, %v202_v45 }
  0x64   : > { %v205_v47 = vrot.slane %v204_v46, 4 }
  0x66   : > { %v206_v48 = vadd.f32 %v205_v47, %v204_v46 }
  0x68   : > { %v207_v49 = vrot.slane %v206_v48, 2 }
  0x6a   : > { %v208_v50 = vadd.f32 %v207_v49, %v206_v48 }
  0x6c   : > { %v209_v51 = vrot.slane %v208_v50, 1 }
  0x6e   : > { %v892_v52 = vadd.f32 %v209_v51, %v208_v50 }
  0x70   : > { %v211_v53 = vmul.f32 0.0078125, %v892_v52 }
  0x72   : > { %v212_v54 = vsub.f32 %v157_v0, %v211_v53  ;;  %v213_v55 = vsub.f32 %v158_v1, %v211_v53  ;;  %v214_v56 = vsub.f32 %v159_v2, %v211_v53  ;;  %v215_v57 = vsub.f32 %v160_v3, %v211_v53 }
  0x73   : > { %v216_v58 = vsub.f32 %v161_v7, %v211_v53  ;;  %v217_v62 = vsub.f32 %v162_v10, %v211_v53  ;;  %v218_v4 = vsub.f32 %v163_v13, %v211_v53  ;;  %v219_v12 = vsub.f32 %v164_v16, %v211_v53 }
  0x74   : > { %v228_v59 = vmul.f32 %v212_v54, %v212_v54  ;;  %v229_v60 = vmul.f32 %v213_v55, %v213_v55  ;;  %v230_v61 = vmul.f32 %v214_v56, %v214_v56  ;;  %v231_v63 = vmul.f32 %v215_v57, %v215_v57 }
  0x75   : > { %v232_v5 = vmul.f32 %v216_v58, %v216_v58  ;;  %v233_v0 = vmul.f32 %v217_v62, %v217_v62  ;;  %v220_v3 = vsub.f32 %v165_v19, %v211_v53  ;;  %v234_v7 = vmul.f32 %v218_v4, %v218_v4 }
  0x76   : > { %v244_v6 = vsel %vm173_vm0, %v228_v59, 0.0  ;;  %v245_v8 = vsel %vm173_vm0, %v229_v60, 0.0  ;;  %v247_v9 = vsel %vm173_vm0, %v230_v61, 0.0  ;;  %v249_v1 = vsel %vm173_vm0, %v231_v63, 0.0 }
  0x77   : > { %v246_v11 = vadd.f32 %v245_v8, %v244_v6  ;;  %v251_v14 = vsel %vm173_vm0, %v232_v5, 0.0  ;;  %v281_v10 = vmul.f32 %v211_v53, %v211_v53  ;;  %v221_v13 = vsub.f32 %v166_v22, %v211_v53 }
  0x78   : > { %v235_v17 = vmul.f32 %v219_v12, %v219_v12  ;;  %v253_v18 = vsel %vm173_vm0, %v233_v0, 0.0  ;;  %v222_v23 = vsub.f32 %v167_v25, %v211_v53  ;;  %v236_v24 = vmul.f32 %v220_v3, %v220_v3 }
  0x79   : > { %v248_v2 = vadd.f32 %v247_v9, %v246_v11  ;;  %v282_v20 = vmul.f32 128.0, %v281_v10  ;;  %v255_v16 = vsel %vm173_vm0, %v234_v7, 0.0  ;;  %v223_v27 = vsub.f32 %v168_v28, %v211_v53 }
  0x7a   : > { %v237_v29 = vmul.f32 %v221_v13, %v221_v13  ;;  %v257_v19 = vsel %vm173_vm0, %v235_v17, 0.0  ;;  %v224_v32 = vsub.f32 %v169_v31, %v211_v53  ;;  %v238_v33 = vmul.f32 %v222_v23, %v222_v23 }
  0x7b   : > { %v250_v15 = vadd.f32 %v249_v1, %v248_v2  ;;  %v259_v35 = vsel %vm173_vm0, %v236_v24, 0.0  ;;  %v225_v36 = vsub.f32 %v170_v34, %v211_v53  ;;  %v239_v38 = vmul.f32 %v223_v27, %v223_v27 }
  0x7c   : > { %v261_v39 = vsel %vm173_vm0, %v237_v29, 0.0  ;;  %v226_v25 = vsub.f32 %v882_v37, %v211_v53  ;;  %v240_v42 = vmul.f32 %v224_v32, %v224_v32  ;;  %v263_v43 = vsel %vm173_vm0, %v238_v33, 0.0 }
  0x7d   : > { %v252_v21 = vadd.f32 %v251_v14, %v250_v15  ;;  %v227_v44 = vsub.f32 %v886_v40, %v211_v53  ;;  %v241_v45 = vmul.f32 %v225_v36, %v225_v36  ;;  %v265_v31 = vsel %vm173_vm0, %v239_v38, 0.0 }
  0x7e   : > { %v242_v47 = vmul.f32 %v226_v25, %v226_v25  ;;  %v267_v48 = vsel %vm173_vm0, %v240_v42, 0.0  ;;  %v679_v62 = vmov (!%p410_p7), 0.0  }
  0x7f   : > { %v254_v26 = vadd.f32 %v253_v18, %v252_v21  ;;  %v243_v49 = vmul.f32 %v227_v44, %v227_v44  ;;  %v269_v50 = vsel %vm173_vm0, %v241_v45, 0.0  ;;  %288 = vst.msk [vmem:[%s153_s25] sm:$0x7] (!%p410_p7), %vm287_vm1, %v679_v62 }
  0x80   : > { %v271_v37 = vsel %vm173_vm0, %v242_v47, 0.0 }
  0x81   : > { %v256_v30 = vadd.f32 %v255_v16, %v254_v26  ;;  %v273_v55 = vsel %vm173_vm0, %v243_v49, 0.0 }
  0x83   : > { %v258_v22 = vadd.f32 %v257_v19, %v256_v30 }
  0x85   : > { %v260_v41 = vadd.f32 %v259_v35, %v258_v22 }
  0x87   : > { %v262_v28 = vadd.f32 %v261_v39, %v260_v41 }
  0x89   : > { %v264_v46 = vadd.f32 %v263_v43, %v262_v28 }
  0x8b   : > { %v266_v34 = vadd.f32 %v265_v31, %v264_v46 }
  0x8d   : > { %v268_v51 = vadd.f32 %v267_v48, %v266_v34 }
  0x8f   : > { %v270_v54 = vadd.f32 %v269_v50, %v268_v51 }
  0x91   : > { %v272_v56 = vadd.f32 %v271_v37, %v270_v54 }
  0x93   : > { %v274_v40 = vadd.f32 %v273_v55, %v272_v56 }
  0x95   : > { %v275_v53 = vrot.slane %v274_v40, 4 }
  0x97   : > { %v276_v57 = vadd.f32 %v275_v53, %v274_v40 }
  0x99   : > { %v277_v58 = vrot.slane %v276_v57, 2  ;;  %286 = sbr.rel (%p410_p7) target bundleno = 160 (0xa0), region = 32 }
  0x9b   : > { %v278_v59 = vadd.f32 %v277_v58, %v276_v57 }
  0x9d   : > { %v279_v60 = vrot.slane %v278_v59, 1 }
  0x9f   : > { %v280_v61 = vadd.f32 %v279_v60, %v278_v59 }
  0xa0 PF: > { %v289_v63 = vld [vmem:[%s153_s25] sm:$0x1]  ;;  %vm291_vm2 = vcmask 24576   ;;  %v293_v4 = vld [vmem:[%s153_s25 + $0x1] sm:$0x1]  ;;  %s412_s18 = sshll.u32 %s662_s13, 6 }
  0xa1   : > { %v290_v5 = vadd.f32 %v289_v63, %v892_v52  ;;  %v294_v6 = vadd.f32 %v293_v4, %v280_v61  ;;  %v296_v8 = vld [vmem:[%s153_s25 + $0x2] sm:$0x1]  ;;  %s313_s22 = sshll.u32 %s153_s25, 4  ;;  %s920_s24 = scalar_lea.hbm %s985_s1, %s412_s18  ;;  %s922_s22 = int_to_ptr.vmem [resolvable:$true] %s313_s22 }
  0xa2   : > { %v297_v9 = vadd.f32 %v296_v8, %v282_v20  ;;  %s300_s30 = scalar_lea.sflag [#allocation4], %s151_s23  ;;  %s552_s27 = scalar_lea.vmem %s922_s22, 64 }
  0xa3   : > { %292 = vst.msk [vmem:[%s153_s25] sm:$0x1] %vm291_vm2, %v290_v5  ;;  %295 = vst.msk [vmem:[%s153_s25 + $0x1] sm:$0x1] %vm291_vm2, %v294_v6  ;;  %p553_p12 = scmp.ne.s32.totalorder %s922_s22, %s552_s27  ;;  %p992_p2 = scmp.ne.s32.totalorder %s989_s4, 0 }
  0xa4   : > { %298 = vst.msk [vmem:[%s153_s25 + $0x2] sm:$0x1] %vm291_vm2, %v297_v9  ;;  %s680_s13 = smov [#allocation5]  }
  0xa5   : > { %p554_p3 = pnand %p553_p12, %p992_p2  ;;  %s556_s17 = sshll.u32 %s680_s13, 4  ;;  %s557_s17 = int_to_ptr.vmem [resolvable:$false] %s556_s17 }
  0xa6   : > { %s558_s26 = scalar_lea.vmem %s557_s17, 128  ;;  %p559_p1 = scmp.lt.s32.totalorder %s922_s22, %s557_s17 }
  0xa7   : > { %p555_p0 = pneg %p554_p3  ;;  %p560_p4 = scmp.lt.s32.totalorder %s558_s26, %s552_s27 }
  0xa9   : > { %p561_p8 = por %p560_p4, %p559_p1 }
  0xab   : > { %p562_p5 = pnand %p561_p8, %p555_p0 }
  0xad   : > { %565 = shalt.err (!%p562_p5)
}
  0xae   : > { %s566_s5 = scalar_lea.hbm %s920_s24, 64  ;;  %s570_s29 = scalar_lea.hbm %s985_s1, 128 }
  0xaf   : > { %p567_p10 = scmp.ne.s32.totalorder %s920_s24, %s566_s5  ;;  %p571_p9 = scmp.lt.u32.totalorder %s920_s24, %s985_s1 }
  0xb0   : > { %p572_p13 = scmp.lt.u32.totalorder %s570_s29, %s566_s5  ;;  %p574_p12 = scmp.lt.u32.totalorder %s566_s5, %s920_s24 }
  0xb1   : > { %p568_p11 = pnand %p567_p10, %p992_p2 }
  0xb2   : > { %p573_p7 = por %p572_p13, %p571_p9 }
  0xb3   : > { %p569_p6 = pneg %p568_p11 }
  0xb4   : > { %p575_p3 = por %p574_p12, %p573_p7 }
  0xb6   : > { %p576_p0 = pnand %p575_p3, %p569_p6 }
  0xb8   : > { %579 = shalt.err (!%p576_p0)
}
  0xb9   : > { %419 = dma.vmem_to_hbm [thread:$0]  (%p992_p2), %s922_s22, 64, %s920_s24, %s300_s30  }
  0xba PF: > { %p430_p1 = scmp.ge.s32.totalorder %s674_s16, 2  ;;  %s325_s21 = sand.u32 1, %s634_s6  }
  0xbb   : > { %p993_p4 = scmp.ne.s32.totalorder %s990_s9, 0  ;;  %s326_s12 = scalar_lea.sflag [#allocation4], %s325_s21 }
  0xbd   : > { %p426_p8 = pnand %p430_p1, %p993_p4 }
  0xbf   : > { %629 = dma.done.wait (!%p426_p8), %s326_s12, 64  }
  0xc0   : > { %631 = vsyncadd (!%p426_p8), %s326_s12, 4294967232  ;;  %s17_s16 = sadd.s32 1, %s674_s16   ;;  %s994_s6 = smov %s638_s7 }
  0xc1   : > { %p14_p5 = scmp.ge.s32.totalorder %s17_s16, 6   ;;  %s995_s7 = smov %s642_s8 }
  0xc2   : > { %s996_s8 = smov %s779_s2  ;;  %s997_s9 = smov %s650_s10 }
  0xc3   : > { %s998_s10 = smov %s654_s11  ;;  %s999_s11 = smov %s782_s3 }
  0xc4   : > { %s1000_s12 = smov %s666_s14  ;;  %s1001_s13 = smov %s670_s15 }
  0xc5   : > { %s1002_s14 = smov %s1005_s19  ;;  %s1003_s15 = smov %s1009_s20 }
  0xc6   :  { %16 = sbr.rel (!%p14_p5) target bundleno = 9 (0x9), region = 73 }
  0xcd   :  { %331 = vsyncpa [#allocation3], 1 }
  0xce   :  { %333 = vsyncpa [#allocation3 + $0x1], 1 }
  0xcf   :  { %334 = vsyncpa [#allocation4], 1 }
  0xd0   :  { %336 = vsyncpa [#allocation4 + $0x1], 1 }

</bundles_post_ra>
